<compile_context>
chip_gen: v7x
topology: tpu7x:2x2x1
jax: 0.10.0
libtpu: 0.0.40
codegen_flags: <defaults>
</compile_context>

<pallas_src>
import functools

import jax
import jax.numpy as jnp
from jax.experimental import pallas as pl
from jax.experimental.pallas import tpu as pltpu

NUM_SLOTS = 11          # 2 team slots + 4 home players + 5 away players
IDX_COLS = 16           # index block padded to 16 int32 columns


def _round_up(n, m):
    return ((n + m - 1) // m) * m


def _fused_kernel(idx_ref, sc_ref, stacked_ref, w1s_ref, b1_ref,
                  w2_ref, b2_ref, w3_ref, b3_ref, o_ref, mh_ref, *,
                  team_pad, player_pad):
    tb = idx_ref.shape[0]
    r_total = mh_ref.shape[1]
    r_bands = 2 * team_pad + 9 * player_pad

    idx = idx_ref[...]                                 # [TB, 16] int32

    # Hoisted iotas, reused for all 11 one-hot compares.
    team_iota = jax.lax.broadcasted_iota(jnp.int32, (tb, team_pad), 1)
    player_iota = jax.lax.broadcasted_iota(jnp.int32, (tb, player_pad), 1)

    # Build the [TB, R_total] bf16 multi-hot in VMEM scratch (128-aligned
    # static column bands; out-of-range indices yield an all-zero band).
    for j in range(2):                                             # team slots
        onehot = (idx[:, j:j + 1] == team_iota).astype(jnp.bfloat16)
        mh_ref[:, j * team_pad:(j + 1) * team_pad] = onehot
    for j in range(9):                                             # players
        onehot = (idx[:, 2 + j:3 + j] == player_iota).astype(jnp.bfloat16)
        off = 2 * team_pad + j * player_pad
        mh_ref[:, off:off + player_pad] = onehot
    if r_total > r_bands:                # MXU-alignment tail pad stays zero
        mh_ref[:, r_bands:r_total] = jnp.zeros((tb, r_total - r_bands),
                                               jnp.bfloat16)

    season = sc_ref[:, 0:1] * (1.0 / 2000.0)           # [TB, 1] f32
    start_min = sc_ref[:, 1:2] * (1.0 / 48.0)          # [TB, 1] f32

    # fc1: one stacked multi-hot matmul + f32 bias / scalar-feature epilogue.
    h1 = jnp.dot(mh_ref[...], stacked_ref[...],
                 preferred_element_type=jnp.float32)               # [TB, H]
    h1 = h1 + b1_ref[...] + season * w1s_ref[0:1, :] + start_min * w1s_ref[1:2, :]
    h1 = jnp.maximum(h1, 0.0)
    # nn.Dropout(0.2): identity in eval mode.

    h2 = jnp.dot(h1.astype(jnp.bfloat16), w2_ref[...],
                 preferred_element_type=jnp.float32) + b2_ref[...]
    h2 = jnp.maximum(h2, 0.0)

    out = jnp.dot(h2.astype(jnp.bfloat16), w3_ref[...],
                  preferred_element_type=jnp.float32) + b3_ref[...]
    o_ref[...] = out.astype(o_ref.dtype)


def nba_lineup_predictor_forward(features, prepared, *, tile_b=512):
    """features: f32 [B, 13]; returns f32 [B, num_players] logits."""
    B = features.shape[0]
    stacked = prepared["stacked"]                  # [R_total, H] bf16
    w1s = prepared["w1_scalar"]                    # [2, H] f32
    b1, w2, b2, w3, b3 = (prepared[k] for k in ("b1", "w2", "b2", "w3", "b3"))
    meta = prepared["meta"]                        # static Python ints
    team_pad, player_pad = meta["team_pad"], meta["player_pad"]
    P = meta["num_out"]
    R_total, H = stacked.shape
    P_pad = w3.shape[1]

    # Index block [B, 16]: [home_team, away_team, home_0..3, away_0..4, pad*5]
    idx = jnp.concatenate(
        [features[:, 1:3].astype(jnp.int32),
         features[:, 4:13].astype(jnp.int32),
         jnp.zeros((B, IDX_COLS - NUM_SLOTS), jnp.int32)], axis=1)
    scalars = jnp.stack([features[:, 0], features[:, 3]], axis=1)   # [B, 2]

    # Batch tiling: 16-aligned (bf16 sublane packing), padded batch multiple
    # of tb.
    b16 = _round_up(B, 16)
    tb = min(_round_up(tile_b, 16), b16)
    # Keep the [tb, R_total] bf16 multi-hot scratch within ~8 MiB of VMEM.
    tb = min(tb, max(16, ((8 << 20) // (2 * R_total)) // 16 * 16))
    # v7x: prefer >=2 grid steps (when batch allows) so both TCs get work.
    if b16 >= 32:
        tb = min(tb, _round_up(-(-b16 // 2), 16))
    b_pad = _round_up(b16, tb)
    if b_pad != B:
        idx = jnp.pad(idx, ((0, b_pad - B), (0, 0)))
        scalars = jnp.pad(scalars, ((0, b_pad - B), (0, 0)))

    kernel = functools.partial(_fused_kernel,
                               team_pad=team_pad, player_pad=player_pad)

    flops = 2 * b_pad * (R_total * H + H * H + H * P_pad)
    weight_bytes = sum(int(a.size) * a.dtype.itemsize
                       for a in (stacked, w1s, b1, w2, b2, w3, b3))
    io_bytes = b_pad * (IDX_COLS * 4 + 2 * 4 + P_pad * 4)

    grid_spec = pltpu.PrefetchScalarGridSpec(
        num_scalar_prefetch=0,
        grid=(b_pad // tb,),
        in_specs=[
            pl.BlockSpec((tb, IDX_COLS), lambda i: (i, 0)),        # idx
            pl.BlockSpec((tb, 2), lambda i: (i, 0)),               # scalars
            pl.BlockSpec((R_total, H), lambda i: (0, 0)),          # stacked W1
            pl.BlockSpec((2, H), lambda i: (0, 0)),                # W1 scalar rows
            pl.BlockSpec((1, H), lambda i: (0, 0)),                # b1
            pl.BlockSpec((H, H), lambda i: (0, 0)),                # W2
            pl.BlockSpec((1, H), lambda i: (0, 0)),                # b2
            pl.BlockSpec((H, P_pad), lambda i: (0, 0)),            # W3 (padded)
            pl.BlockSpec((1, P_pad), lambda i: (0, 0)),            # b3 (padded)
        ],
        out_specs=pl.BlockSpec((tb, P_pad), lambda i: (i, 0)),
        scratch_shapes=[pltpu.VMEM((tb, R_total), jnp.bfloat16)],  # multi-hot
    )

    out = pl.pallas_call(
        kernel,
        out_shape=jax.ShapeDtypeStruct((b_pad, P_pad), jnp.float32),
        grid_spec=grid_spec,
        compiler_params=pltpu.CompilerParams(
            dimension_semantics=("parallel",)),
        cost_estimate=pl.CostEstimate(
            flops=flops, transcendentals=0,
            bytes_accessed=weight_bytes + io_bytes),
    )(idx, scalars, stacked, w1s, b1, w2, b2, w3, b3)
    return out[:B, :P]


def prepare_params(params):
    """One-time prep: fold embedding tables into W1, stack, cast to bf16."""
    team = params["team_embedding"]                    # [n_teams,  E] f32
    player = params["player_embedding"]                # [n_players, E] f32
    w1 = params["w1"]                                  # [706, H] f32
    H = w1.shape[1]
    E = player.shape[1]
    n_teams, n_players = team.shape[0], player.shape[0]
    team_pad = _round_up(n_teams, 128)
    player_pad = _round_up(n_players, 128)

    w1_emb = w1[:NUM_SLOTS * E].reshape(NUM_SLOTS, E, H)           # f32
    w1_scalar = w1[NUM_SLOTS * E:NUM_SLOTS * E + 2]                # [2, H] f32

    # Fold each slot's table through its W1 segment (f32), pad rows to 128
    # multiples, stack into one big fc1 matrix, then cast once to bf16.
    bands = []
    for j in range(NUM_SLOTS):
        tab = team if j < 2 else player
        pad_rows = team_pad if j < 2 else player_pad
        folded = tab @ w1_emb[j]                                   # [rows, H]
        bands.append(jnp.pad(folded, ((0, pad_rows - tab.shape[0]), (0, 0))))
    stacked = jnp.concatenate(bands, axis=0)
    r_total = _round_up(stacked.shape[0], 256)          # MXU-depth alignment
    stacked = jnp.pad(stacked, ((0, r_total - stacked.shape[0]), (0, 0)))
    stacked = stacked.astype(jnp.bfloat16)

    P = params["w3"].shape[1]
    p_pad = _round_up(P, 128)                           # lane-dense output
    w3 = jnp.pad(params["w3"], ((0, 0), (0, p_pad - P))).astype(jnp.bfloat16)
    b3 = jnp.pad(params["b3"], (0, p_pad - P))[None, :]

    return {
        "stacked": stacked,                             # [R_total, H] bf16
        "w1_scalar": w1_scalar,                         # [2, H] f32
        "b1": params["b1"][None, :],
        "w2": params["w2"].astype(jnp.bfloat16),
        "b2": params["b2"][None, :],
        "w3": w3,
        "b3": b3,
        # Static layout metadata (Python ints) — keep `prepared` closed over
        # (not traced) when jitting the forward.
        "meta": {"team_pad": team_pad, "player_pad": player_pad, "num_out": P},
    }


def init_params(key, num_players, num_teams, embedding_dim=64, hidden_dim=128):
    ks = jax.random.split(key, 8)
    input_dim = 9 * embedding_dim + 2 * embedding_dim + 2

    def linear(kw, kb, fan_in, fan_out):
        bound = 1.0 / (fan_in ** 0.5)
        w = jax.random.uniform(kw, (fan_in, fan_out), jnp.float32, -bound, bound)
        b = jax.random.uniform(kb, (fan_out,), jnp.float32, -bound, bound)
        return w, b

    w1, b1 = linear(ks[2], ks[3], input_dim, hidden_dim)
    w2, b2 = linear(ks[4], ks[5], hidden_dim, hidden_dim)
    w3, b3 = linear(ks[6], ks[7], hidden_dim, num_players)
    return {
        "player_embedding": jax.random.normal(ks[0], (num_players, embedding_dim), jnp.float32),
        "team_embedding": jax.random.normal(ks[1], (num_teams, embedding_dim), jnp.float32),
        "w1": w1, "b1": b1, "w2": w2, "b2": b2, "w3": w3, "b3": b3,
    }


if __name__ == "__main__":
    num_players = 128
    num_teams = 32
    embedding_dim = 64
    hidden_dim = 128
    batch = 8

    key = jax.random.PRNGKey(0)
    pkey, fkey = jax.random.split(key)
    params = init_params(pkey, num_players, num_teams, embedding_dim, hidden_dim)
    prepared = prepare_params(params)

    fk = jax.random.split(fkey, 6)
    season = jax.random.randint(fk[0], (batch, 1), 2007, 2016).astype(jnp.float32)
    home_team = jax.random.randint(fk[1], (batch, 1), 0, num_teams).astype(jnp.float32)
    away_team = jax.random.randint(fk[2], (batch, 1), 0, num_teams).astype(jnp.float32)
    starting_min = jax.random.randint(fk[3], (batch, 1), 0, 48).astype(jnp.float32)
    home_players = jax.random.randint(fk[4], (batch, 4), 0, num_players).astype(jnp.float32)
    away_players = jax.random.randint(fk[5], (batch, 5), 0, num_players).astype(jnp.float32)

    features = jnp.concatenate(
        [season, home_team, away_team, starting_min, home_players, away_players],
        axis=1,
    )  # [batch, 13]

    # Close over `prepared` so its static Python-int metadata is not traced.
    fwd = jax.jit(lambda f: nba_lineup_predictor_forward(f, prepared))
    out = fwd(features)
    jax.block_until_ready(out)
    assert out.shape == (batch, num_players), out.shape

    # Pure-JAX f32 reference of the original module (eval mode).
    def ref(features, p):
        B = features.shape[0]
        x = jnp.concatenate(
            [p["team_embedding"][features[:, 1].astype(jnp.int32)],
             p["team_embedding"][features[:, 2].astype(jnp.int32)],
             p["player_embedding"][features[:, 4:8].astype(jnp.int32)].reshape(B, -1),
             p["player_embedding"][features[:, 8:13].astype(jnp.int32)].reshape(B, -1),
             features[:, 0:1] / 2000.0,
             features[:, 3:4] / 48.0], axis=1)
        h = jnp.maximum(x @ p["w1"] + p["b1"], 0.0)
        h = jnp.maximum(h @ p["w2"] + p["b2"], 0.0)
        return h @ p["w3"] + p["b3"]

    ref_out = ref(features, params)
    # bf16 matmul inputs (incl. folded table) with f32 accumulation.
    assert jnp.allclose(out, ref_out, atol=5e-2, rtol=5e-2), (
        float(jnp.max(jnp.abs(out - ref_out))))

    print("KERNEL_OK")
</pallas_src>

<mosaic_0001>
module attributes {stable_mosaic.version = 11 : i64} {
  func.func @_fused_kernel(%arg0: i32, %arg1: memref<16x16xi32, #tpu.memory_space<vmem>>, %arg2: memref<16x2xf32, #tpu.memory_space<vmem>>, %arg3: memref<1536x128xbf16, #tpu.memory_space<vmem>>, %arg4: memref<2x128xf32, #tpu.memory_space<vmem>>, %arg5: memref<1x128xf32, #tpu.memory_space<vmem>>, %arg6: memref<128x128xbf16, #tpu.memory_space<vmem>>, %arg7: memref<1x128xf32, #tpu.memory_space<vmem>>, %arg8: memref<128x128xbf16, #tpu.memory_space<vmem>>, %arg9: memref<1x128xf32, #tpu.memory_space<vmem>>, %arg10: memref<16x128xf32, #tpu.memory_space<vmem>>, %arg11: memref<16x1536xbf16, #tpu.memory_space<vmem>>) attributes {dimension_semantics = [#tpu.dimension_semantics<parallel>], iteration_bounds = array<i64: 1>, scalar_prefetch = 0 : i64, scratch_operands = 1 : i64, tpu.core_type = #tpu.core_type<tc>, window_params = [{transform_indices = @transform_0, window_bounds = array<i64: 16, 16>}, {transform_indices = @transform_1, window_bounds = array<i64: 16, 2>}, {pipeline_mode = #tpu.pipeline_mode<synchronous>, transform_indices = @transform_2, window_bounds = array<i64: 1536, 128>}, {pipeline_mode = #tpu.pipeline_mode<synchronous>, transform_indices = @transform_3, window_bounds = array<i64: 2, 128>}, {pipeline_mode = #tpu.pipeline_mode<synchronous>, transform_indices = @transform_4, window_bounds = array<i64: 1, 128>}, {pipeline_mode = #tpu.pipeline_mode<synchronous>, transform_indices = @transform_5, window_bounds = array<i64: 128, 128>}, {pipeline_mode = #tpu.pipeline_mode<synchronous>, transform_indices = @transform_6, window_bounds = array<i64: 1, 128>}, {pipeline_mode = #tpu.pipeline_mode<synchronous>, transform_indices = @transform_7, window_bounds = array<i64: 128, 128>}, {pipeline_mode = #tpu.pipeline_mode<synchronous>, transform_indices = @transform_8, window_bounds = array<i64: 1, 128>}, {transform_indices = @transform_9, window_bounds = array<i64: 16, 128>}]} {
    %c0 = arith.constant 0 : index
    %c0_0 = arith.constant 0 : index
    %0 = vector.load %arg1[%c0, %c0_0] : memref<16x16xi32, #tpu.memory_space<vmem>>, vector<16x16xi32>
    %1 = tpu.iota {dimensions = array<i32: 1>} : vector<16x128xi32>
    %2 = tpu.iota {dimensions = array<i32: 1>} : vector<16x128xi32>
    %3 = vector.extract_strided_slice %0 {offsets = [0, 0], sizes = [16, 1], strides = [1, 1]} : vector<16x16xi32> to vector<16x1xi32>
    %4 = vector.broadcast %3 : vector<16x1xi32> to vector<16x128xi32>
    %5 = arith.cmpi eq, %4, %1 : vector<16x128xi32>
    %6 = arith.extui %5 : vector<16x128xi1> to vector<16x128xi32>
    %7 = arith.sitofp %6 : vector<16x128xi32> to vector<16x128xf32>
    %8 = arith.truncf %7 : vector<16x128xf32> to vector<16x128xbf16>
    %c0_1 = arith.constant 0 : index
    %c0_2 = arith.constant 0 : index
    %9 = vector.load %arg11[%c0_1, %c0_2] : memref<16x1536xbf16, #tpu.memory_space<vmem>>, vector<16x128xbf16>
    tpu.vector_store %arg11[%c0_1, %c0_2], %8 {strides = array<i32>} : memref<16x1536xbf16, #tpu.memory_space<vmem>>, vector<16x128xbf16>,
    %10 = vector.extract_strided_slice %0 {offsets = [0, 1], sizes = [16, 1], strides = [1, 1]} : vector<16x16xi32> to vector<16x1xi32>
    %11 = vector.broadcast %10 : vector<16x1xi32> to vector<16x128xi32>
    %12 = arith.cmpi eq, %11, %1 : vector<16x128xi32>
    %13 = arith.extui %12 : vector<16x128xi1> to vector<16x128xi32>
    %14 = arith.sitofp %13 : vector<16x128xi32> to vector<16x128xf32>
    %15 = arith.truncf %14 : vector<16x128xf32> to vector<16x128xbf16>
    %c0_3 = arith.constant 0 : index
    %c128 = arith.constant 128 : index
    %16 = vector.load %arg11[%c0_3, %c128] : memref<16x1536xbf16, #tpu.memory_space<vmem>>, vector<16x128xbf16>
    tpu.vector_store %arg11[%c0_3, %c128], %15 {strides = array<i32>} : memref<16x1536xbf16, #tpu.memory_space<vmem>>, vector<16x128xbf16>,
    %17 = vector.extract_strided_slice %0 {offsets = [0, 2], sizes = [16, 1], strides = [1, 1]} : vector<16x16xi32> to vector<16x1xi32>
    %18 = vector.broadcast %17 : vector<16x1xi32> to vector<16x128xi32>
    %19 = arith.cmpi eq, %18, %2 : vector<16x128xi32>
    %20 = arith.extui %19 : vector<16x128xi1> to vector<16x128xi32>
    %21 = arith.sitofp %20 : vector<16x128xi32> to vector<16x128xf32>
    %22 = arith.truncf %21 : vector<16x128xf32> to vector<16x128xbf16>
    %c0_4 = arith.constant 0 : index
    %c256 = arith.constant 256 : index
    %23 = vector.load %arg11[%c0_4, %c256] : memref<16x1536xbf16, #tpu.memory_space<vmem>>, vector<16x128xbf16>
    tpu.vector_store %arg11[%c0_4, %c256], %22 {strides = array<i32>} : memref<16x1536xbf16, #tpu.memory_space<vmem>>, vector<16x128xbf16>,
    %24 = vector.extract_strided_slice %0 {offsets = [0, 3], sizes = [16, 1], strides = [1, 1]} : vector<16x16xi32> to vector<16x1xi32>
    %25 = vector.broadcast %24 : vector<16x1xi32> to vector<16x128xi32>
    %26 = arith.cmpi eq, %25, %2 : vector<16x128xi32>
    %27 = arith.extui %26 : vector<16x128xi1> to vector<16x128xi32>
    %28 = arith.sitofp %27 : vector<16x128xi32> to vector<16x128xf32>
    %29 = arith.truncf %28 : vector<16x128xf32> to vector<16x128xbf16>
    %c0_5 = arith.constant 0 : index
    %c384 = arith.constant 384 : index
    %30 = vector.load %arg11[%c0_5, %c384] : memref<16x1536xbf16, #tpu.memory_space<vmem>>, vector<16x128xbf16>
    tpu.vector_store %arg11[%c0_5, %c384], %29 {strides = array<i32>} : memref<16x1536xbf16, #tpu.memory_space<vmem>>, vector<16x128xbf16>,
    %31 = vector.extract_strided_slice %0 {offsets = [0, 4], sizes = [16, 1], strides = [1, 1]} : vector<16x16xi32> to vector<16x1xi32>
    %32 = vector.broadcast %31 : vector<16x1xi32> to vector<16x128xi32>
    %33 = arith.cmpi eq, %32, %2 : vector<16x128xi32>
    %34 = arith.extui %33 : vector<16x128xi1> to vector<16x128xi32>
    %35 = arith.sitofp %34 : vector<16x128xi32> to vector<16x128xf32>
    %36 = arith.truncf %35 : vector<16x128xf32> to vector<16x128xbf16>
    %c0_6 = arith.constant 0 : index
    %c512 = arith.constant 512 : index
    %37 = vector.load %arg11[%c0_6, %c512] : memref<16x1536xbf16, #tpu.memory_space<vmem>>, vector<16x128xbf16>
    tpu.vector_store %arg11[%c0_6, %c512], %36 {strides = array<i32>} : memref<16x1536xbf16, #tpu.memory_space<vmem>>, vector<16x128xbf16>,
    %38 = vector.extract_strided_slice %0 {offsets = [0, 5], sizes = [16, 1], strides = [1, 1]} : vector<16x16xi32> to vector<16x1xi32>
    %39 = vector.broadcast %38 : vector<16x1xi32> to vector<16x128xi32>
    %40 = arith.cmpi eq, %39, %2 : vector<16x128xi32>
    %41 = arith.extui %40 : vector<16x128xi1> to vector<16x128xi32>
    %42 = arith.sitofp %41 : vector<16x128xi32> to vector<16x128xf32>
    %43 = arith.truncf %42 : vector<16x128xf32> to vector<16x128xbf16>
    %c0_7 = arith.constant 0 : index
    %c640 = arith.constant 640 : index
    %44 = vector.load %arg11[%c0_7, %c640] : memref<16x1536xbf16, #tpu.memory_space<vmem>>, vector<16x128xbf16>
    tpu.vector_store %arg11[%c0_7, %c640], %43 {strides = array<i32>} : memref<16x1536xbf16, #tpu.memory_space<vmem>>, vector<16x128xbf16>,
    %45 = vector.extract_strided_slice %0 {offsets = [0, 6], sizes = [16, 1], strides = [1, 1]} : vector<16x16xi32> to vector<16x1xi32>
    %46 = vector.broadcast %45 : vector<16x1xi32> to vector<16x128xi32>
    %47 = arith.cmpi eq, %46, %2 : vector<16x128xi32>
    %48 = arith.extui %47 : vector<16x128xi1> to vector<16x128xi32>
    %49 = arith.sitofp %48 : vector<16x128xi32> to vector<16x128xf32>
    %50 = arith.truncf %49 : vector<16x128xf32> to vector<16x128xbf16>
    %c0_8 = arith.constant 0 : index
    %c768 = arith.constant 768 : index
    %51 = vector.load %arg11[%c0_8, %c768] : memref<16x1536xbf16, #tpu.memory_space<vmem>>, vector<16x128xbf16>
    tpu.vector_store %arg11[%c0_8, %c768], %50 {strides = array<i32>} : memref<16x1536xbf16, #tpu.memory_space<vmem>>, vector<16x128xbf16>,
    %52 = vector.extract_strided_slice %0 {offsets = [0, 7], sizes = [16, 1], strides = [1, 1]} : vector<16x16xi32> to vector<16x1xi32>
    %53 = vector.broadcast %52 : vector<16x1xi32> to vector<16x128xi32>
    %54 = arith.cmpi eq, %53, %2 : vector<16x128xi32>
    %55 = arith.extui %54 : vector<16x128xi1> to vector<16x128xi32>
    %56 = arith.sitofp %55 : vector<16x128xi32> to vector<16x128xf32>
    %57 = arith.truncf %56 : vector<16x128xf32> to vector<16x128xbf16>
    %c0_9 = arith.constant 0 : index
    %c896 = arith.constant 896 : index
    %58 = vector.load %arg11[%c0_9, %c896] : memref<16x1536xbf16, #tpu.memory_space<vmem>>, vector<16x128xbf16>
    tpu.vector_store %arg11[%c0_9, %c896], %57 {strides = array<i32>} : memref<16x1536xbf16, #tpu.memory_space<vmem>>, vector<16x128xbf16>,
    %59 = vector.extract_strided_slice %0 {offsets = [0, 8], sizes = [16, 1], strides = [1, 1]} : vector<16x16xi32> to vector<16x1xi32>
    %60 = vector.broadcast %59 : vector<16x1xi32> to vector<16x128xi32>
    %61 = arith.cmpi eq, %60, %2 : vector<16x128xi32>
    %62 = arith.extui %61 : vector<16x128xi1> to vector<16x128xi32>
    %63 = arith.sitofp %62 : vector<16x128xi32> to vector<16x128xf32>
    %64 = arith.truncf %63 : vector<16x128xf32> to vector<16x128xbf16>
    %c0_10 = arith.constant 0 : index
    %c1024 = arith.constant 1024 : index
    %65 = vector.load %arg11[%c0_10, %c1024] : memref<16x1536xbf16, #tpu.memory_space<vmem>>, vector<16x128xbf16>
    tpu.vector_store %arg11[%c0_10, %c1024], %64 {strides = array<i32>} : memref<16x1536xbf16, #tpu.memory_space<vmem>>, vector<16x128xbf16>,
    %66 = vector.extract_strided_slice %0 {offsets = [0, 9], sizes = [16, 1], strides = [1, 1]} : vector<16x16xi32> to vector<16x1xi32>
    %67 = vector.broadcast %66 : vector<16x1xi32> to vector<16x128xi32>
    %68 = arith.cmpi eq, %67, %2 : vector<16x128xi32>
    %69 = arith.extui %68 : vector<16x128xi1> to vector<16x128xi32>
    %70 = arith.sitofp %69 : vector<16x128xi32> to vector<16x128xf32>
    %71 = arith.truncf %70 : vector<16x128xf32> to vector<16x128xbf16>
    %c0_11 = arith.constant 0 : index
    %c1152 = arith.constant 1152 : index
    %72 = vector.load %arg11[%c0_11, %c1152] : memref<16x1536xbf16, #tpu.memory_space<vmem>>, vector<16x128xbf16>
    tpu.vector_store %arg11[%c0_11, %c1152], %71 {strides = array<i32>} : memref<16x1536xbf16, #tpu.memory_space<vmem>>, vector<16x128xbf16>,
    %73 = vector.extract_strided_slice %0 {offsets = [0, 10], sizes = [16, 1], strides = [1, 1]} : vector<16x16xi32> to vector<16x1xi32>
    %74 = vector.broadcast %73 : vector<16x1xi32> to vector<16x128xi32>
    %75 = arith.cmpi eq, %74, %2 : vector<16x128xi32>
    %76 = arith.extui %75 : vector<16x128xi1> to vector<16x128xi32>
    %77 = arith.sitofp %76 : vector<16x128xi32> to vector<16x128xf32>
    %78 = arith.truncf %77 : vector<16x128xf32> to vector<16x128xbf16>
    %c0_12 = arith.constant 0 : index
    %c1280 = arith.constant 1280 : index
    %79 = vector.load %arg11[%c0_12, %c1280] : memref<16x1536xbf16, #tpu.memory_space<vmem>>, vector<16x128xbf16>
    tpu.vector_store %arg11[%c0_12, %c1280], %78 {strides = array<i32>} : memref<16x1536xbf16, #tpu.memory_space<vmem>>, vector<16x128xbf16>,
    %cst = arith.constant 0.000000e+00 : bf16
    %80 = vector.broadcast %cst : bf16 to vector<16x128xbf16>
    %c0_13 = arith.constant 0 : index
    %c1408 = arith.constant 1408 : index
    %81 = vector.load %arg11[%c0_13, %c1408] : memref<16x1536xbf16, #tpu.memory_space<vmem>>, vector<16x128xbf16>
    tpu.vector_store %arg11[%c0_13, %c1408], %80 {strides = array<i32>} : memref<16x1536xbf16, #tpu.memory_space<vmem>>, vector<16x128xbf16>,
    %c0_14 = arith.constant 0 : index
    %c0_15 = arith.constant 0 : index
    %82 = vector.load %arg2[%c0_14, %c0_15] : memref<16x2xf32, #tpu.memory_space<vmem>>, vector<16x1xf32>
    %cst_16 = arith.constant 5.000000e-04 : f32
    %83 = vector.broadcast %cst_16 : f32 to vector<16x1xf32>
    %84 = arith.mulf %82, %83 : vector<16x1xf32>
    %c0_17 = arith.constant 0 : index
    %c1 = arith.constant 1 : index
    %85 = vector.load %arg2[%c0_17, %c1] : memref<16x2xf32, #tpu.memory_space<vmem>>, vector<16x1xf32>
    %cst_18 = arith.constant 0.020833334 : f32
    %86 = vector.broadcast %cst_18 : f32 to vector<16x1xf32>
    %87 = arith.mulf %85, %86 : vector<16x1xf32>
    %c0_19 = arith.constant 0 : index
    %c0_20 = arith.constant 0 : index
    %88 = vector.load %arg11[%c0_19, %c0_20] : memref<16x1536xbf16, #tpu.memory_space<vmem>>, vector<16x1536xbf16>
    %c0_21 = arith.constant 0 : index
    %c0_22 = arith.constant 0 : index
    %89 = vector.load %arg3[%c0_21, %c0_22] : memref<1536x128xbf16, #tpu.memory_space<vmem>>, vector<1536x128xbf16>
    %cst_23 = arith.constant dense<0.000000e+00> : vector<16x128xf32>
    %90 = tpu.matmul %88, %89, %cst_23 {dimension_numbers = #tpu.dot_dimension_numbers<[1], [0], [0], [1], [0, 0, 1, 1], [], []>} : vector<16x1536xbf16>, vector<1536x128xbf16>, vector<16x128xf32> -> vector<16x128xf32>
    %c0_24 = arith.constant 0 : index
    %c0_25 = arith.constant 0 : index
    %91 = vector.load %arg5[%c0_24, %c0_25] : memref<1x128xf32, #tpu.memory_space<vmem>>, vector<1x128xf32>
    %92 = vector.broadcast %91 : vector<1x128xf32> to vector<16x128xf32>
    %93 = arith.addf %90, %92 : vector<16x128xf32>
    %c0_26 = arith.constant 0 : index
    %c0_27 = arith.constant 0 : index
    %94 = vector.load %arg4[%c0_26, %c0_27] : memref<2x128xf32, #tpu.memory_space<vmem>>, vector<1x128xf32>
    %95 = vector.broadcast %84 : vector<16x1xf32> to vector<16x128xf32>
    %96 = vector.broadcast %94 : vector<1x128xf32> to vector<16x128xf32>
    %97 = arith.mulf %95, %96 : vector<16x128xf32>
    %98 = arith.addf %93, %97 : vector<16x128xf32>
    %c1_28 = arith.constant 1 : index
    %c0_29 = arith.constant 0 : index
    %99 = vector.load %arg4[%c1_28, %c0_29] : memref<2x128xf32, #tpu.memory_space<vmem>>, vector<1x128xf32>
    %100 = vector.broadcast %87 : vector<16x1xf32> to vector<16x128xf32>
    %101 = vector.broadcast %99 : vector<1x128xf32> to vector<16x128xf32>
    %102 = arith.mulf %100, %101 : vector<16x128xf32>
    %103 = arith.addf %98, %102 : vector<16x128xf32>
    %cst_30 = arith.constant 0.000000e+00 : f32
    %104 = vector.broadcast %cst_30 : f32 to vector<16x128xf32>
    %105 = arith.maximumf %103, %104 : vector<16x128xf32>
    %106 = arith.truncf %105 : vector<16x128xf32> to vector<16x128xbf16>
    %c0_31 = arith.constant 0 : index
    %c0_32 = arith.constant 0 : index
    %107 = vector.load %arg6[%c0_31, %c0_32] : memref<128x128xbf16, #tpu.memory_space<vmem>>, vector<128x128xbf16>
    %cst_33 = arith.constant dense<0.000000e+00> : vector<16x128xf32>
    %108 = tpu.matmul %106, %107, %cst_33 {dimension_numbers = #tpu.dot_dimension_numbers<[1], [0], [0], [1], [0, 0, 1, 1], [], []>} : vector<16x128xbf16>, vector<128x128xbf16>, vector<16x128xf32> -> vector<16x128xf32>
    %c0_34 = arith.constant 0 : index
    %c0_35 = arith.constant 0 : index
    %109 = vector.load %arg7[%c0_34, %c0_35] : memref<1x128xf32, #tpu.memory_space<vmem>>, vector<1x128xf32>
    %110 = vector.broadcast %109 : vector<1x128xf32> to vector<16x128xf32>
    %111 = arith.addf %108, %110 : vector<16x128xf32>
    %cst_36 = arith.constant 0.000000e+00 : f32
    %112 = vector.broadcast %cst_36 : f32 to vector<16x128xf32>
    %113 = arith.maximumf %111, %112 : vector<16x128xf32>
    %114 = arith.truncf %113 : vector<16x128xf32> to vector<16x128xbf16>
    %c0_37 = arith.constant 0 : index
    %c0_38 = arith.constant 0 : index
    %115 = vector.load %arg8[%c0_37, %c0_38] : memref<128x128xbf16, #tpu.memory_space<vmem>>, vector<128x128xbf16>
    %cst_39 = arith.constant dense<0.000000e+00> : vector<16x128xf32>
    %116 = tpu.matmul %114, %115, %cst_39 {dimension_numbers = #tpu.dot_dimension_numbers<[1], [0], [0], [1], [0, 0, 1, 1], [], []>} : vector<16x128xbf16>, vector<128x128xbf16>, vector<16x128xf32> -> vector<16x128xf32>
    %c0_40 = arith.constant 0 : index
    %c0_41 = arith.constant 0 : index
    %117 = vector.load %arg9[%c0_40, %c0_41] : memref<1x128xf32, #tpu.memory_space<vmem>>, vector<1x128xf32>
    %118 = vector.broadcast %117 : vector<1x128xf32> to vector<16x128xf32>
    %119 = arith.addf %116, %118 : vector<16x128xf32>
    %c0_42 = arith.constant 0 : index
    %c0_43 = arith.constant 0 : index
    %120 = vector.load %arg10[%c0_42, %c0_43] : memref<16x128xf32, #tpu.memory_space<vmem>>, vector<16x128xf32>
    tpu.vector_store %arg10[%c0_42, %c0_43], %119 {strides = array<i32>} : memref<16x128xf32, #tpu.memory_space<vmem>>, vector<16x128xf32>,
    return
  }
  func.func @transform_0(%arg0: i32) -> (i32, i32) {
    %c0_i32 = arith.constant 0 : i32
    %c0_i32_0 = arith.constant 0 : i32
    return %arg0, %c0_i32 : i32, i32
  }
  func.func @transform_1(%arg0: i32) -> (i32, i32) {
    %c0_i32 = arith.constant 0 : i32
    %c0_i32_0 = arith.constant 0 : i32
    return %arg0, %c0_i32 : i32, i32
  }
  func.func @transform_2(%arg0: i32) -> (i32, i32) {
    %c0_i32 = arith.constant 0 : i32
    %c0_i32_0 = arith.constant 0 : i32
    %c0_i32_1 = arith.constant 0 : i32
    return %c0_i32, %c0_i32_0 : i32, i32
  }
  func.func @transform_3(%arg0: i32) -> (i32, i32) {
    %c0_i32 = arith.constant 0 : i32
    %c0_i32_0 = arith.constant 0 : i32
    %c0_i32_1 = arith.constant 0 : i32
    return %c0_i32, %c0_i32_0 : i32, i32
  }
  func.func @transform_4(%arg0: i32) -> (i32, i32) {
    %c0_i32 = arith.constant 0 : i32
    %c0_i32_0 = arith.constant 0 : i32
    %c0_i32_1 = arith.constant 0 : i32
    return %c0_i32, %c0_i32_0 : i32, i32
  }
  func.func @transform_5(%arg0: i32) -> (i32, i32) {
    %c0_i32 = arith.constant 0 : i32
    %c0_i32_0 = arith.constant 0 : i32
    %c0_i32_1 = arith.constant 0 : i32
    return %c0_i32, %c0_i32_0 : i32, i32
  }
  func.func @transform_6(%arg0: i32) -> (i32, i32) {
    %c0_i32 = arith.constant 0 : i32
    %c0_i32_0 = arith.constant 0 : i32
    %c0_i32_1 = arith.constant 0 : i32
    return %c0_i32, %c0_i32_0 : i32, i32
  }
  func.func @transform_7(%arg0: i32) -> (i32, i32) {
    %c0_i32 = arith.constant 0 : i32
    %c0_i32_0 = arith.constant 0 : i32
    %c0_i32_1 = arith.constant 0 : i32
    return %c0_i32, %c0_i32_0 : i32, i32
  }
  func.func @transform_8(%arg0: i32) -> (i32, i32) {
    %c0_i32 = arith.constant 0 : i32
    %c0_i32_0 = arith.constant 0 : i32
    %c0_i32_1 = arith.constant 0 : i32
    return %c0_i32, %c0_i32_0 : i32, i32
  }
  func.func @transform_9(%arg0: i32) -> (i32, i32) {
    %c0_i32 = arith.constant 0 : i32
    %c0_i32_0 = arith.constant 0 : i32
    return %arg0, %c0_i32 : i32, i32
  }
}

</mosaic_0001>

<bundles_post_ra>
// kernel: _lambda_.1
= control target key start
LH: loop header
LB: loop body
LE: loop exit
PB: predicated region body
PF: predicated region fallthrough
CT: control target
= control target key end

     0   :  { %14 = vsyncpa [#allocation4], 0  ;;  %s2045_s30 = smov [#allocation3]   ;;  %s2291_s0 = inlined_call_operand.vmem [shape: s32[16,16], index: 0, kind: input, shape index: {}]   ;;  %s2292_s1 = inlined_call_operand.vmem [shape: f32[16,2], index: 1, kind: input, shape index: {}]   ;;  %s2293_s2 = inlined_call_operand.hbm [shape: bf16[1536,128], index: 2, kind: input, shape index: {}]   ;;  %s2294_s3 = inlined_call_operand.vmem [shape: f32[2,128], index: 3, kind: input, shape index: {}]   ;;  %s2295_s4 = inlined_call_operand.vmem [shape: f32[1,128], index: 4, kind: input, shape index: {}]   ;;  %s2296_s5 = inlined_call_operand.vmem [shape: bf16[128,128], index: 5, kind: input, shape index: {}]   ;;  %s2297_s6 = inlined_call_operand.vmem [shape: f32[1,128], index: 6, kind: input, shape index: {}]   ;;  %s2298_s7 = inlined_call_operand.vmem [shape: bf16[128,128], index: 7, kind: input, shape index: {}]   ;;  %s2299_s8 = inlined_call_operand.vmem [shape: f32[1,128], index: 8, kind: input, shape index: {}]   ;;  %s2300_s9 = inlined_call_operand.vmem [shape: f32[16,128], index: 9, kind: output, shape index: {}]  }
   0x1   :  { %s24_s10 = sshll.u32 %s2045_s30, 4  ;;  %s2021_s13 = scalar_lea.hbm %s2293_s2, 12288  ;;  %s25_s10 = int_to_ptr.vmem [resolvable:$true] %s24_s10 }
   0x2   :  { %p2022_p0 = scmp.ne.s32.totalorder %s2293_s2, %s2021_s13  ;;  %p2025_p1 = scmp.lt.u32.totalorder %s2021_s13, %s2293_s2 }
   0x4   :  { %p2027_p2 = pnand %p2025_p1, %p2022_p0 }
   0x6   :  { %2030 = shalt.err (!%p2027_p2)
}
   0x7   :  { %s2031_s18 = scalar_lea.vmem %s25_s10, 12288  ;;  %p2036_p4 = scmp.lt.s32.totalorder %s25_s10, %s25_s10 }
   0x8   :  { %p2032_p3 = scmp.ne.s32.totalorder %s25_s10, %s2031_s18  ;;  %p2037_p5 = scmp.lt.s32.totalorder %s2031_s18, %s2031_s18 }
   0xa   :  { %p2038_p6 = por %p2037_p5, %p2036_p4 }
   0xc   :  { %p2039_p7 = pnand %p2038_p6, %p2032_p3 }
   0xe   :  { %2042 = shalt.err (!%p2039_p7)
}
   0xf   :  { %s2046_s19 = smov 64   ;;  %s2047_s20 = smov 4  }
  0x10   :  { %30 = dma.hbm_to_vmem [thread:$0]  %s2293_s2, 12288, %s25_s10, [#allocation4], %s2046_s19, %s2046_s19, %s2047_s20  }
  0x11   :  { %2043 = dma.done.wait [#allocation4], 12288  }
  0x12   :  { %2044 = vsyncadd [#allocation4], 4294955008  ;;  %v2048_v0 = vmov 1   ;;  %v2049_v1 = vmov 0   ;;  %v2129_v2 = vld [vmem:[%s2291_s0] sm:$0xff]  ;;  %v2134_v3 = vld [vmem:[%s2291_s0 + $0x8] sm:$0xff]  ;;  %v49_v53 = vlaneseq }
  0x13   :  { %1888 = vset.pattern.permute.xlu0 %v2048_v0  ;;  %1889 = vset.pattern.permute.xlu1 %v2049_v1  ;;  %v1909_v4 = vld [vmem:[#allocation3 + $0x40] sm:$0xff]   ;;  %v1911_v6 = vld [vmem:[#allocation3 + $0x48] sm:$0xff]   ;;  %v1913_v8 = vld [vmem:[#allocation3 + $0x50] sm:$0xff]   ;;  %v2050_v12 = vmov 3   ;;  %v2051_v18 = vmov 2   ;;  %v2052_v23 = vmov 5  }
  0x14   :  { %52 = vperm.xlu1 %1889, %v2129_v2   ;;  %66 = vperm.xlu0 %1888, %v2129_v2   ;;  %v1910_v5 = vld [vmem:[#allocation3] sm:$0xff]   ;;  %v1912_v7 = vld [vmem:[#allocation3 + $0x8] sm:$0xff]   ;;  %v1914_v9 = vld [vmem:[#allocation3 + $0x10] sm:$0xff]   ;;  %v2053_v24 = vmov 4   ;;  %v2054_v30 = vmov 7   ;;  %v2055_v35 = vmov 9  }
  0x15   :  { %1681 = vmatprep.subr.bf16.mxu0 %v1909_v4  ;;  %v1915_v10 = vld [vmem:[#allocation3 + $0xc0] sm:$0xff]   ;;  %v1917_v13 = vld [vmem:[#allocation3 + $0x58] sm:$0xff]   ;;  %v1919_v15 = vld [vmem:[#allocation3 + $0xc8] sm:$0xff]   ;;  %v2056_v40 = vmov 8   ;;  %v2057_v43 = vmov 6   ;;  %v2058_v46 = vmov 10  }
  0x16   :  { %1682 = vmatpush3.bf16.msra.mxu0 %v1910_v5  ;;  %v1916_v11 = vld [vmem:[#allocation3 + $0x80] sm:$0xff]   ;;  %v1918_v14 = vld [vmem:[#allocation3 + $0x18] sm:$0xff]   ;;  %1703 = vmatprep.subr.bf16.mxu1 %v1915_v10  ;;  %v1920_v16 = vld [vmem:[#allocation3 + $0x88] sm:$0xff]   ;;  %v2168_v56 = vand.u32 127, %v49_v53  ;;  %v2059_v61 = vmov 1.0|1.0  }
  0x17   :  { %1683 = vmatprep.subr.bf16.mxu0 %v1911_v6  ;;  %1704 = vmatpush3.bf16.msra.mxu1 %v1916_v11  ;;  %v1921_v17 = vld [vmem:[#allocation3 + $0x60] sm:$0xff]   ;;  %v1923_v19 = vld [vmem:[#allocation3 + $0xd0] sm:$0xff]   ;;  %v1925_v22 = vld [vmem:[#allocation3 + $0x68] sm:$0xff]  }
  0x18   :  { %55 = vperm.xlu1 %1889, %v2134_v3   ;;  %69 = vperm.xlu0 %1888, %v2134_v3   ;;  %v1922_v20 = vld [vmem:[#allocation3 + $0x20] sm:$0xff]   ;;  %v1924_v21 = vld [vmem:[#allocation3 + $0x90] sm:$0xff]   ;;  %v1927_v25 = vld [vmem:[#allocation3 + $0xd8] sm:$0xff]  }
  0x19   :  { %1705 = vmatprep.subr.bf16.mxu1 %v1919_v15  ;;  %v1926_v26 = vld [vmem:[#allocation3 + $0x28] sm:$0xff]   ;;  %v1928_v27 = vld [vmem:[#allocation3 + $0x98] sm:$0xff]   ;;  %v1929_v28 = vld [vmem:[#allocation3 + $0x70] sm:$0xff]  }
  0x1a   :  { %1684 = vmatpush3.bf16.msra.mxu0 %v1912_v7  ;;  %v1931_v29 = vld [vmem:[#allocation3 + $0xe0] sm:$0xff]   ;;  %v1930_v31 = vld [vmem:[#allocation3 + $0x30] sm:$0xff]   ;;  %v1933_v33 = vld [vmem:[#allocation3 + $0x78] sm:$0xff]  }
  0x1b   :  { %1685 = vmatprep.subr.bf16.mxu0 %v1913_v8  ;;  %1706 = vmatpush3.bf16.msra.mxu1 %v1920_v16  ;;  %v1932_v32 = vld [vmem:[#allocation3 + $0xa0] sm:$0xff]   ;;  %v1935_v34 = vld [vmem:[#allocation3 + $0xe8] sm:$0xff]   ;;  %v1934_v36 = vld [vmem:[#allocation3 + $0x38] sm:$0xff]  }
  0x1c   :  { %1891 = vset.pattern.permute.xlu1 %v2050_v12  ;;  %1890 = vset.pattern.permute.xlu0 %v2050_v12  ;;  %v1936_v37 = vld [vmem:[#allocation3 + $0xa8] sm:$0xff]   ;;  %v1937_v38 = vld [vmem:[#allocation3 + $0x140] sm:$0xff]   ;;  %v1938_v39 = vld [vmem:[#allocation3 + $0xf0] sm:$0xff]  }
  0x1d   :  { %97 = vperm.xlu1 %1891, %v2134_v3   ;;  %94 = vperm.xlu0 %1890, %v2129_v2   ;;  %v1940_v41 = vld [vmem:[#allocation3 + $0xb0] sm:$0xff]   ;;  %v1942_v42 = vld [vmem:[#allocation3 + $0xf8] sm:$0xff]   ;;  %v1947_v45 = vld [vmem:[#allocation3 + $0x1c0] sm:$0xff]  }
  0x1e   :  { %1686 = vmatpush3.bf16.msra.mxu0 %v1914_v9  ;;  %1707 = vmatprep.subr.bf16.mxu1 %v1923_v19  ;;  %v1944_v44 = vld [vmem:[#allocation3 + $0xb8] sm:$0xff]   ;;  %v207_v47 = vld [vmem:[%s2292_s1 + $0x8] sm:$0xff]  ;;  %v206_v49 = vld [vmem:[%s2292_s1] sm:$0xff] }
  0x1f   :  { %1687 = vmatprep.subr.bf16.mxu0 %v1917_v13  ;;  %1708 = vmatpush3.bf16.msra.mxu1 %v1924_v21  ;;  %v209_v48 = vmul.f32 0.0005, %v207_v47  ;;  %v211_v50 = vmul.f32 0.020833334, %v207_v47  ;;  %v208_v51 = vmul.f32 0.0005, %v206_v49 }
  0x20   :  { %1709 = vmatprep.subr.bf16.mxu1 %v1927_v25  ;;  %v210_v52 = vmul.f32 0.020833334, %v206_v49  ;;  %v1939_v59 = vld [vmem:[#allocation3 + $0x100] sm:$0xff]   ;;  %v1941_v60 = vld [vmem:[#allocation3 + $0x148] sm:$0xff]   ;;  %v1946_v5 = vld [vmem:[#allocation3 + $0x110] sm:$0xff]  }
  0x21   :  { %1892 = vset.pattern.permute.xlu1 %v2051_v18  ;;  %1893 = vset.pattern.permute.xlu0 %v2051_v18  ;;  %v1948_v6 = vld [vmem:[#allocation3 + $0x180] sm:$0xff]   ;;  %v1949_v7 = vld [vmem:[#allocation3 + $0x158] sm:$0xff]   ;;  %v1951_v8 = vld [vmem:[#allocation3 + $0x1c8] sm:$0xff]  }
  0x22   :  { %80 = vperm.xlu1 %1892, %v2129_v2   ;;  %83 = vperm.xlu0 %1893, %v2134_v3   ;;  %v1950_v9 = vld [vmem:[#allocation3 + $0x118] sm:$0xff]   ;;  %v1952_v10 = vld [vmem:[#allocation3 + $0x188] sm:$0xff]   ;;  %v1953_v12 = vld [vmem:[#allocation3 + $0x160] sm:$0xff]  }
  0x23   :  { %1688 = vmatpush3.bf16.msra.mxu0 %v1918_v14  ;;  %1710 = vmatpush3.bf16.msra.mxu1 %v1928_v27  ;;  %v1955_v13 = vld [vmem:[#allocation3 + $0x1d0] sm:$0xff]   ;;  %v1954_v14 = vld [vmem:[#allocation3 + $0x120] sm:$0xff]   ;;  %v1959_v19 = vld [vmem:[#allocation3 + $0x1d8] sm:$0xff]  }
  0x24   :  { %1689 = vmatprep.subr.bf16.mxu0 %v1921_v17  ;;  %1711 = vmatprep.subr.bf16.mxu1 %v1931_v29  ;;  %v1956_v15 = vld [vmem:[#allocation3 + $0x190] sm:$0xff]   ;;  %v1957_v17 = vld [vmem:[#allocation3 + $0x168] sm:$0xff]   ;;  %v1960_v21 = vld [vmem:[#allocation3 + $0x198] sm:$0xff]  }
  0x25   :  { %v1964_v27 = vld [vmem:[#allocation3 + $0x1a0] sm:$0xff]   ;;  %v1967_v29 = vld [vmem:[#allocation3 + $0x1e8] sm:$0xff]  }
  0x26   :  { %1894 = vset.pattern.permute.xlu1 %v2052_v23  ;;  %1895 = vset.pattern.permute.xlu0 %v2053_v24  ;;  %v1963_v23 = vld [vmem:[#allocation3 + $0x1e0] sm:$0xff]   ;;  %v1983_v49 = vld [vmem:[#allocation3 + $0x2c8] sm:$0xff]  }
  0x27   :  { %122 = vperm.xlu1 %1894, %v2129_v2   ;;  %108 = vperm.xlu0 %1895, %v2129_v2   ;;  %v1980_v47 = vld [vmem:[#allocation3 + $0x280] sm:$0xff]  }
  0x28   :  { %1690 = vmatpush3.bf16.msra.mxu0 %v1922_v20  ;;  %1712 = vmatpush3.bf16.msra.mxu1 %v1932_v32  ;;  %v1958_v20 = vld [vmem:[#allocation3 + $0x128] sm:$0xff]   ;;  %v1985_v53 = vld [vmem:[#allocation3 + $0x260] sm:$0xff]  }
  0x29   :  { %1691 = vmatprep.subr.bf16.mxu0 %v1925_v22  ;;  %1713 = vmatprep.subr.bf16.mxu1 %v1935_v34  ;;  %v1961_v22 = vld [vmem:[#allocation3 + $0x170] sm:$0xff]   ;;  %v1968_v32 = vld [vmem:[#allocation3 + $0x1a8] sm:$0xff]  }
  0x2a   :  { %v1970_v34 = vld [vmem:[#allocation3 + $0x1f0] sm:$0xff]  }
  0x2b   :  { %125 = vperm.xlu1 %1894, %v2134_v3   ;;  %1898 = vset.pattern.permute.xlu0 %v2054_v30 }
  0x2c   :  { %153 = vperm.xlu0 %1898, %v2134_v3   ;;  %1692 = vmatpush3.bf16.msra.mxu0 %v1926_v26  ;;  %v1962_v26 = vld [vmem:[#allocation3 + $0x130] sm:$0xff]  }
  0x2d   :  { %1693 = vmatprep.subr.bf16.mxu0 %v1929_v28  ;;  %1714 = vmatpush3.bf16.msra.mxu1 %v1936_v37  ;;  %v1965_v28 = vld [vmem:[#allocation3 + $0x178] sm:$0xff]   ;;  %v1972_v37 = vld [vmem:[#allocation3 + $0x1b0] sm:$0xff]  }
  0x2e   :  { %1715 = vmatprep.subr.bf16.mxu1 %v1938_v39  ;;  %v1974_v39 = vld [vmem:[#allocation3 + $0x1f8] sm:$0xff]  }
  0x2f   :  { %1896 = vset.pattern.permute.xlu1 %v2053_v24 }
  0x30   :  { %111 = vperm.xlu1 %1896, %v2134_v3   ;;  %1900 = vset.pattern.permute.xlu0 %v2055_v35 }
  0x31   :  { %178 = vperm.xlu0 %1900, %v2129_v2   ;;  %1694 = vmatpush3.bf16.msra.mxu0 %v1930_v31  ;;  %v1966_v31 = vld [vmem:[#allocation3 + $0x138] sm:$0xff]  }
  0x32   :  { %1695 = vmatprep.subr.bf16.mxu0 %v1933_v33  ;;  %1716 = vmatpush3.bf16.msra.mxu1 %v1940_v41  ;;  %v1969_v33 = vld [vmem:[#allocation3 + $0x240] sm:$0xff]   ;;  %v1975_v41 = vld [vmem:[#allocation3 + $0x208] sm:$0xff]  }
  0x33   :  { %1717 = vmatprep.subr.bf16.mxu1 %v1942_v42  ;;  %v1976_v42 = vld [vmem:[#allocation3 + $0x1b8] sm:$0xff]  }
  0x34   :  { %1897 = vset.pattern.permute.xlu1 %v2054_v30 }
  0x35   :  { %150 = vperm.xlu1 %1897, %v2129_v2   ;;  %1903 = vset.pattern.permute.xlu0 %v2056_v40 }
  0x36   :  { %167 = vperm.xlu0 %1903, %v2134_v3   ;;  %1696 = vmatpush3.bf16.msra.mxu0 %v1934_v36  ;;  %v1971_v36 = vld [vmem:[#allocation3 + $0x200] sm:$0xff]  }
  0x37   :  { %1725 = vmatprep.subr.bf16.mxu0 %v1937_v38  ;;  %1718 = vmatpush3.bf16.msra.mxu1 %v1944_v44  ;;  %v1973_v38 = vld [vmem:[#allocation3 + $0x248] sm:$0xff]   ;;  %v1979_v44 = vld [vmem:[#allocation3 + $0x2c0] sm:$0xff]  }
  0x38   :  { %1747 = vmatprep.subr.bf16.mxu1 %v1947_v45 }
  0x39   :  { %1899 = vset.pattern.permute.xlu1 %v2057_v43  ;;  %v1977_v43 = vld [vmem:[#allocation3 + $0x250] sm:$0xff]  }
  0x3a   :  { %136 = vperm.xlu1 %1899, %v2129_v2   ;;  %1905 = vset.pattern.permute.xlu0 %v2049_v1 }
  0x3b   :  { %1248 = vperm.xlu0 %1905, %v208_v51   ;;  %v1982_v51 = vld [vmem:[#allocation3 + $0x218] sm:$0xff]  }
  0x3e   :  { %139 = vperm.xlu1 %1899, %v2134_v3  }
  0x3f   :  { %1908 = vset.pattern.permute.xlu0 %v2048_v0 }
  0x40   :  { %1272 = vperm.xlu0 %1908, %v211_v50  }
  0x42   :  { %1901 = vset.pattern.permute.xlu1 %v2055_v35 }
  0x43   :  { %181 = vperm.xlu1 %1901, %v2134_v3  }
  0x47   :  { %1902 = vset.pattern.permute.xlu1 %v2056_v40 }
  0x48   :  { %164 = vperm.xlu1 %1902, %v2129_v2  }
  0x4c   :  { %1904 = vset.pattern.permute.xlu1 %v2058_v46  ;;  %v1978_v46 = vld [vmem:[#allocation3 + $0x210] sm:$0xff]  }
  0x4d   :  { %192 = vperm.xlu1 %1904, %v2129_v2   ;;  %v1945_v2 = vld [vmem:[#allocation3 + $0x150] sm:$0xff]  }
  0x51   :  { %195 = vperm.xlu1 %1904, %v2134_v3  }
  0x55   :  { %1906 = vset.pattern.permute.xlu1 %v2049_v1 }
  0x56   :  { %1253 = vperm.xlu1 %1906, %v209_v48   ;;  %v1981_v48 = vld [vmem:[#allocation3 + $0x258] sm:$0xff]  }
  0x5a   :  { %1907 = vset.pattern.permute.xlu1 %v2048_v0  ;;  %v1943_v0 = vld [vmem:[#allocation3 + $0x108] sm:$0xff]  }
  0x5b   :  { %1267 = vperm.xlu1 %1907, %v210_v52   ;;  %v1984_v52 = vld [vmem:[#allocation3 + $0x288] sm:$0xff]  }
  0x93   :  { %v53_v54 = vpop.permute.xlu1 %52  ;;  %v67_v55 = vpop.permute.xlu0 %66 }
  0x94   :  { %vm57_vm0 = vcmp.eq.s32.totalorder %v53_v54, %v2168_v56  ;;  %vm71_vm3 = vcmp.eq.s32.totalorder %v67_v55, %v2168_v56  ;;  %v1987_v54 = vld [vmem:[#allocation3 + $0x2d0] sm:$0xff]   ;;  %v1986_v55 = vld [vmem:[#allocation3 + $0x220] sm:$0xff]  }
  0x97   :  { %v56_v57 = vpop.permute.xlu1 %55  ;;  %v70_v58 = vpop.permute.xlu0 %69 }
  0x98   :  { %vm58_vm1 = vcmp.eq.s32.totalorder %v56_v57, %v2168_v56  ;;  %vm72_vm2 = vcmp.eq.s32.totalorder %v70_v58, %v2168_v56  ;;  %v1988_v57 = vld [vmem:[#allocation3 + $0x290] sm:$0xff]   ;;  %v1989_v58 = vld [vmem:[#allocation3 + $0x268] sm:$0xff]  }
  0x99   :  { %vm1661_vm4 = vmpackc.low %vm58_vm1, %vm57_vm0 }
  0x9a   :  { %vm1659_vm5 = vmpackc.low %vm72_vm2, %vm71_vm3 }
  0x9b   :  { %1660 = vmatprep.mubr.msk.bf16.mxu0 %vm1659_vm5, %v2059_v61 }
  0x9c   :  { %1662 = vmatmul.mubr.msk.bf16.vlgmr.msra.gmra.mrb[0].mxu0 %vm1661_vm4, %v2059_v61  ;;  %v98_v62 = vpop.permute.xlu1 %97  ;;  %v95_v63 = vpop.permute.xlu0 %94 }
  0x9d   :  { %1726 = vmatpush3.bf16.msra.mxu0 %v1939_v59  ;;  %vm100_vm6 = vcmp.eq.s32.totalorder %v98_v62, %v2168_v56  ;;  %vm99_vm7 = vcmp.eq.s32.totalorder %v95_v63, %v2168_v56  ;;  %v1991_v59 = vld [vmem:[#allocation3 + $0x2d8] sm:$0xff]   ;;  %v1993_v63 = vld [vmem:[#allocation3 + $0x270] sm:$0xff]  }
  0x9e   :  { %1727 = vmatprep.subr.bf16.mxu0 %v1941_v60  ;;  %vm1663_vm8 = vmpackc.low %vm100_vm6, %vm99_vm7  ;;  %v1990_v60 = vld [vmem:[#allocation3 + $0x228] sm:$0xff]   ;;  %v1992_v62 = vld [vmem:[#allocation3 + $0x298] sm:$0xff]  }
  0x9f   :  { %1664 = vmatprep.mubr.msk.bf16.mxu1 %vm1663_vm8, %v2059_v61 }
  0xa1   :  { %1728 = vmatpush3.bf16.msra.mxu0 %v1943_v0  ;;  %v81_v3 = vpop.permute.xlu1 %80  ;;  %v84_v4 = vpop.permute.xlu0 %83  ;;  %v1995_v0 = vld [vmem:[#allocation3 + $0x2e0] sm:$0xff]  }
  0xa2   :  { %vm85_vm9 = vcmp.eq.s32.totalorder %v81_v3, %v2168_v56  ;;  %vm86_vm10 = vcmp.eq.s32.totalorder %v84_v4, %v2168_v56  ;;  %1729 = vmatprep.subr.bf16.mxu0 %v1945_v2  ;;  %v1994_v2 = vld [vmem:[#allocation3 + $0x230] sm:$0xff]   ;;  %v1996_v3 = vld [vmem:[#allocation3 + $0x2a0] sm:$0xff]   ;;  %v1997_v4 = vld [vmem:[#allocation3 + $0x278] sm:$0xff]  }
  0xa3   :  { %vm1665_vm11 = vmpackc.low %vm86_vm10, %vm85_vm9 }
  0xa4   :  { %1666 = vmatmul.mubr.msk.bf16.vlgmr.msra.gmra.mrb[0].mxu1 %vm1665_vm11, %v2059_v61 }
  0xa5   :  { %1730 = vmatpush3.bf16.msra.mxu0 %v1946_v5  ;;  %1748 = vmatpush3.bf16.msra.mxu1 %v1948_v6  ;;  %v1999_v5 = vld [vmem:[#allocation3 + $0x2e8] sm:$0xff]  }
  0xa6   :  { %v123_v11 = vpop.permute.xlu1 %122  ;;  %1731 = vmatprep.subr.bf16.mxu0 %v1949_v7  ;;  %1749 = vmatprep.subr.bf16.mxu1 %v1951_v8  ;;  %v109_v18 = vpop.permute.xlu0 %108  ;;  %v1998_v7 = vld [vmem:[#allocation3 + $0x238] sm:$0xff]   ;;  %v2000_v8 = vld [vmem:[#allocation3 + $0x2a8] sm:$0xff]  }
  0xa7   :  { %vm127_vm12 = vcmp.eq.s32.totalorder %v123_v11, %v2168_v56  ;;  %vm113_vm3 = vcmp.eq.s32.totalorder %v109_v18, %v2168_v56  ;;  %v2002_v11 = vld [vmem:[#allocation3 + $0x2b0] sm:$0xff]   ;;  %v2009_v18 = vld [vmem:[%s2296_s5 + $0x20] sm:$0xff]  }
  0xa9   :  { %1732 = vmatpush3.bf16.msra.mxu0 %v1950_v9  ;;  %1750 = vmatpush3.bf16.msra.mxu1 %v1952_v10  ;;  %v2001_v9 = vld [vmem:[#allocation3 + $0x2f0] sm:$0xff]  }
  0xaa   :  { %v126_v16 = vpop.permute.xlu1 %125  ;;  %1733 = vmatprep.subr.bf16.mxu0 %v1953_v12  ;;  %1751 = vmatprep.subr.bf16.mxu1 %v1955_v13  ;;  %v2003_v12 = vld [vmem:[#allocation3 + $0x2f8] sm:$0xff]  }
  0xab   :  { %vm128_vm13 = vcmp.eq.s32.totalorder %v126_v16, %v2168_v56  ;;  %v154_v25 = vpop.permute.xlu0 %153  ;;  %v2060_v16 = vmov 0.0  }
  0xac   :  { %vm1667_vm14 = vmpackc.low %vm128_vm13, %vm127_vm12  ;;  %vm156_vm15 = vcmp.eq.s32.totalorder %v154_v25, %v2168_v56  ;;  %v2016_v25 = vld [vmem:[%s2298_s7 + $0x18] sm:$0xff]  }
  0xad   :  { %1734 = vmatpush3.bf16.msra.mxu0 %v1954_v14  ;;  %1752 = vmatpush3.bf16.msra.mxu1 %v1956_v15  ;;  %v2004_v14 = vld [vmem:[#allocation3 + $0x2b8] sm:$0xff]   ;;  %v2005_v15 = vld [vmem:[%s2296_s5] sm:$0xff]  }
  0xae   :  { %1668 = vmatprep.mubr.msk.bf16.mxu0 %vm1667_vm14, %v2059_v61  ;;  %1735 = vmatprep.subr.bf16.mxu0 %v1957_v17  ;;  %v2006_v17 = vld [vmem:[%s2296_s5 + $0x8] sm:$0xff]  }
  0xaf   :  { %1753 = vmatprep.subr.bf16.mxu1 %v1959_v19  ;;  %v112_v24 = vpop.permute.xlu1 %111  ;;  %v2010_v19 = vld [vmem:[%s2296_s5 + $0x28] sm:$0xff]  }
  0xb0   :  { %vm114_vm2 = vcmp.eq.s32.totalorder %v112_v24, %v2168_v56  ;;  %v179_v45 = vpop.permute.xlu0 %178  ;;  %v2015_v24 = vld [vmem:[%s2298_s7 + $0x10] sm:$0xff]  }
  0xb1   :  { %1736 = vmatpush3.bf16.msra.mxu0 %v1958_v20  ;;  %1754 = vmatpush3.bf16.msra.mxu1 %v1960_v21  ;;  %vm1669_vm4 = vmpackc.low %vm114_vm2, %vm113_vm3  ;;  %vm183_vm7 = vcmp.eq.s32.totalorder %v179_v45, %v2168_v56  ;;  %v2011_v20 = vld [vmem:[%s2296_s5 + $0x30] sm:$0xff]   ;;  %v2012_v21 = vld [vmem:[%s2296_s5 + $0x38] sm:$0xff]  }
  0xb2   :  { %1737 = vmatprep.subr.bf16.mxu0 %v1961_v22  ;;  %1755 = vmatprep.subr.bf16.mxu1 %v1963_v23  ;;  %v2013_v22 = vld [vmem:[%s2298_s7] sm:$0xff]   ;;  %v2014_v23 = vld [vmem:[%s2298_s7 + $0x8] sm:$0xff]  }
  0xb4   :  { %v151_v30 = vpop.permute.xlu1 %150 }
  0xb5   :  { %1738 = vmatpush3.bf16.msra.mxu0 %v1962_v26  ;;  %1756 = vmatpush3.bf16.msra.mxu1 %v1964_v27  ;;  %vm155_vm0 = vcmp.eq.s32.totalorder %v151_v30, %v2168_v56  ;;  %v168_v6 = vpop.permute.xlu0 %167  ;;  %v2017_v26 = vld [vmem:[%s2298_s7 + $0x20] sm:$0xff]   ;;  %v2018_v27 = vld [vmem:[%s2298_s7 + $0x28] sm:$0xff]  }
  0xb6   :  { %1739 = vmatprep.subr.bf16.mxu0 %v1965_v28  ;;  %1757 = vmatprep.subr.bf16.mxu1 %v1967_v29  ;;  %vm1671_vm1 = vmpackc.low %vm156_vm15, %vm155_vm0  ;;  %vm170_vm12 = vcmp.eq.s32.totalorder %v168_v6, %v2168_v56 }
  0xb7   :  { %1672 = vmatprep.mubr.msk.bf16.mxu1 %vm1671_vm1, %v2059_v61  ;;  %vm2061_vm1 = vmmov 0  }
  0xb9   :  { %1740 = vmatpush3.bf16.msra.mxu0 %v1966_v31  ;;  %1758 = vmatpush3.bf16.msra.mxu1 %v1968_v32  ;;  %v137_v35 = vpop.permute.xlu1 %136 }
  0xba   :  { %1769 = vmatprep.subr.bf16.mxu0 %v1969_v33  ;;  %1759 = vmatprep.subr.bf16.mxu1 %v1970_v34  ;;  %vm141_vm5 = vcmp.eq.s32.totalorder %v137_v35, %v2168_v56  ;;  %v1542_v34 = vld [vmem:[%s2295_s4] ss:$0 sm:$0xff] }
  0xbc   :  { %1670 = vmatmul.mubr.msk.bf16.vlgmr.msra.gmra.mrb[4].mxu0 %vm1669_vm4, %v2059_v61 }
  0xbd   :  { %1770 = vmatpush3.bf16.msra.mxu0 %v1971_v36  ;;  %1760 = vmatpush3.bf16.msra.mxu1 %v1972_v37  ;;  %v140_v40 = vpop.permute.xlu1 %139 }
  0xbe   :  { %1771 = vmatprep.subr.bf16.mxu0 %v1973_v38  ;;  %1761 = vmatprep.subr.bf16.mxu1 %v1974_v39  ;;  %vm142_vm6 = vcmp.eq.s32.totalorder %v140_v40, %v2168_v56 }
  0xbf   :  { %vm1673_vm8 = vmpackc.low %vm142_vm6, %vm141_vm5 }
  0xc1   :  { %1772 = vmatpush3.bf16.msra.mxu0 %v1975_v41  ;;  %1762 = vmatpush3.bf16.msra.mxu1 %v1976_v42 }
  0xc2   :  { %1773 = vmatprep.subr.bf16.mxu0 %v1977_v43  ;;  %1791 = vmatprep.subr.bf16.mxu1 %v1979_v44  ;;  %v182_v50 = vpop.permute.xlu1 %181 }
  0xc3   :  { %vm184_vm9 = vcmp.eq.s32.totalorder %v182_v50, %v2168_v56 }
  0xc4   :  { %1674 = vmatmul.mubr.msk.bf16.vlgmr.msra.gmra.mrb[4].mxu1 %vm1673_vm8, %v2059_v61  ;;  %vm1675_vm10 = vmpackc.low %vm184_vm9, %vm183_vm7 }
  0xc5   :  { %1774 = vmatpush3.bf16.msra.mxu0 %v1978_v46  ;;  %1792 = vmatpush3.bf16.msra.mxu1 %v1980_v47 }
  0xc6   :  { %1775 = vmatprep.subr.bf16.mxu0 %v1981_v48  ;;  %1793 = vmatprep.subr.bf16.mxu1 %v1983_v49 }
  0xc7   :  { %1676 = vmatprep.mubr.msk.bf16.mxu0 %vm1675_vm10, %v2059_v61  ;;  %1236 = vmatprep.mubr.bf16.mxu1 %v2049_v1  ;;  %v165_v1 = vpop.permute.xlu1 %164 }
  0xc8   :  { %vm169_vm11 = vcmp.eq.s32.totalorder %v165_v1, %v2168_v56 }
  0xc9   :  { %1776 = vmatpush3.bf16.msra.mxu0 %v1982_v51  ;;  %1794 = vmatpush3.bf16.msra.mxu1 %v1984_v52  ;;  %vm1677_vm13 = vmpackc.low %vm170_vm12, %vm169_vm11 }
  0xca   :  { %1777 = vmatprep.subr.bf16.mxu0 %v1985_v53  ;;  %1795 = vmatprep.subr.bf16.mxu1 %v1987_v54 }
  0xcc   :  { %v193_v10 = vpop.permute.xlu1 %192 }
  0xcd   :  { %1778 = vmatpush3.bf16.msra.mxu0 %v1986_v55  ;;  %1796 = vmatpush3.bf16.msra.mxu1 %v1988_v57  ;;  %vm197_vm14 = vcmp.eq.s32.totalorder %v193_v10, %v2168_v56 }
  0xce   :  { %1779 = vmatprep.subr.bf16.mxu0 %v1989_v58  ;;  %1797 = vmatprep.subr.bf16.mxu1 %v1991_v59 }
  0xd0   :  { %v196_v13 = vpop.permute.xlu1 %195 }
  0xd1   :  { %1780 = vmatpush3.bf16.msra.mxu0 %v1990_v60  ;;  %1798 = vmatpush3.bf16.msra.mxu1 %v1992_v62  ;;  %vm198_vm15 = vcmp.eq.s32.totalorder %v196_v13, %v2168_v56  ;;  %v2007_v56 = vld [vmem:[%s2296_s5 + $0x10] sm:$0xff]  }
  0xd2   :  { %1781 = vmatprep.subr.bf16.mxu0 %v1993_v63  ;;  %1799 = vmatprep.subr.bf16.mxu1 %v1995_v0  ;;  %vm1679_vm0 = vmpackc.low %vm198_vm15, %vm197_vm14 }
  0xd5   :  { %1782 = vmatpush3.bf16.msra.mxu0 %v1994_v2  ;;  %1800 = vmatpush3.bf16.msra.mxu1 %v1996_v3 }
  0xd6   :  { %1783 = vmatprep.subr.bf16.mxu0 %v1997_v4  ;;  %1801 = vmatprep.subr.bf16.mxu1 %v1999_v5  ;;  %v1254_v4 = vpop.permute.xlu1 %1253 }
  0xd9   :  { %1784 = vmatpush3.bf16.msra.mxu0 %v1998_v7  ;;  %1802 = vmatpush3.bf16.msra.mxu1 %v2000_v8  ;;  %v1249_v7 = vpop.permute.xlu0 %1248 }
  0xda   :  { %1803 = vmatprep.subr.bf16.mxu1 %v2001_v9  ;;  %1831 = vmatprep.subr.bf16.mxu0 %v2060_v16  ;;  %v1639_v9 = vld [vmem:[%s2294_s3] ss:$0 sm:$0xff]  ;;  %v1268_v13 = vpop.permute.xlu1 %1267 }
  0xdc   :  { %1678 = vmatmul.mubr.msk.bf16.vlgmr.msra.gmra.mrb[8].mxu0 %vm1677_vm13, %v2059_v61 }
  0xdd   :  { %1804 = vmatpush3.bf16.msra.mxu1 %v2002_v11  ;;  %1832 = vmatpush3.bf16.msra.mxu0 %v2005_v15 }
  0xde   :  { %1805 = vmatprep.subr.bf16.mxu1 %v2003_v12  ;;  %1833 = vmatprep.subr.bf16.mxu0 %v2060_v16  ;;  %v1640_v12 = vld [vmem:[%s2294_s3 + $0x1] ss:$0 sm:$0xff] }
  0xdf   :  { %1847 = vmatprep.mubr.msk.bf16.mxu0 %vm2061_vm1, %v2060_v16 }
  0xe1   :  { %1806 = vmatpush3.bf16.msra.mxu1 %v2004_v14  ;;  %1834 = vmatpush3.bf16.msra.mxu0 %v2006_v17  ;;  %v1260_v17 = vmul.f32 %v1639_v9, %v1249_v7 }
  0xe2   :  { %1851 = vmatprep.subr.bf16.mxu1 %v2060_v16  ;;  %1835 = vmatprep.subr.bf16.mxu0 %v2060_v16 }
  0xe4   :  { %1680 = vmatmul.mubr.msk.bf16.vlgmr.msra.gmra.mrb[8].mxu1 %vm1679_vm0, %v2059_v61  ;;  %v2008_v61 = vld [vmem:[%s2296_s5 + $0x18] sm:$0xff]  }
  0xe5   :  { %1836 = vmatpush3.bf16.msra.mxu0 %v2007_v56  ;;  %1867 = vmatprep.mubr.msk.bf16.mxu1 %vm2061_vm1, %v2060_v16 }
  0xe6   :  { %1837 = vmatprep.subr.bf16.mxu0 %v2060_v16  ;;  %1852 = vmatpush3.bf16.msra.mxu1 %v2013_v22 }
  0xe7   :  { %1853 = vmatprep.subr.bf16.mxu1 %v2060_v16 }
  0xe9   :  { %1838 = vmatpush3.bf16.msra.mxu0 %v2008_v61  ;;  %v1273_v61 = vpop.permute.xlu0 %1272 }
  0xea   :  { %1839 = vmatprep.subr.bf16.mxu0 %v2060_v16  ;;  %1854 = vmatpush3.bf16.msra.mxu1 %v2014_v23 }
  0xeb   :  { %1855 = vmatprep.subr.bf16.mxu1 %v2060_v16 }
  0xed   :  { %1840 = vmatpush3.bf16.msra.mxu0 %v2009_v18 }
  0xee   :  { %1841 = vmatprep.subr.bf16.mxu0 %v2060_v16  ;;  %1856 = vmatpush3.bf16.msra.mxu1 %v2015_v24  ;;  %v1280_v24 = vmul.f32 %v1640_v12, %v1273_v61 }
  0xef   :  { %1857 = vmatprep.subr.bf16.mxu1 %v2060_v16 }
  0xf1   :  { %1842 = vmatpush3.bf16.msra.mxu0 %v2010_v19 }
  0xf2   :  { %1843 = vmatprep.subr.bf16.mxu0 %v2060_v16  ;;  %1858 = vmatpush3.bf16.msra.mxu1 %v2016_v25 }
  0xf3   :  { %1859 = vmatprep.subr.bf16.mxu1 %v2060_v16 }
  0xf5   :  { %1844 = vmatpush3.bf16.msra.mxu0 %v2011_v20  ;;  %v1279_v20 = vmul.f32 %v1640_v12, %v1268_v13 }
  0xf6   :  { %1845 = vmatprep.subr.bf16.mxu0 %v2060_v16  ;;  %1860 = vmatpush3.bf16.msra.mxu1 %v2017_v26 }
  0xf7   :  { %1861 = vmatprep.subr.bf16.mxu1 %v2060_v16 }
  0xf9   :  { %1846 = vmatpush3.bf16.msra.mxu0 %v2012_v21  ;;  %v1261_v21 = vmul.f32 %v1639_v9, %v1254_v4 }
  0xfa   :  { %1862 = vmatpush3.bf16.msra.mxu1 %v2018_v27 }
  0xfb   :  { %1863 = vmatprep.subr.bf16.mxu1 %v2060_v16 }
 0x16f   :  { %v1697_v28 = vpop.f32.mrb[0].mxu0 }
 0x170   :  { %v1698_v29 = vpop.f32.mrb[1].mxu0 }
 0x171   :  { %v1699_v30 = vadd.f32 %v1698_v29, %v1697_v28  ;;  %v1700_v31 = vpop.f32.mrb[2].mxu0 }
 0x172   :  { %v1701_v32 = vpop.f32.mrb[3].mxu0 }
 0x173   :  { %v1702_v33 = vadd.f32 %v1701_v32, %v1700_v31  ;;  %v1034_v37 = vadd.f32 %v1699_v30, %v1542_v34  ;;  %v2019_v31 = vld [vmem:[%s2298_s7 + $0x30] sm:$0xff]   ;;  %v2020_v32 = vld [vmem:[%s2298_s7 + $0x38] sm:$0xff]  }
 0x174   :  { %1864 = vmatpush3.bf16.msra.mxu1 %v2019_v31 }
 0x175   :  { %v1037_v41 = vadd.f32 %v1702_v33, %v1542_v34  ;;  %1865 = vmatprep.subr.bf16.mxu1 %v2060_v16  ;;  %v1641_v33 = vld [vmem:[%s2297_s6] ss:$0 sm:$0xff] }
 0x176   :  { %v1650_v16 = vld [vmem:[%s2299_s8] ss:$0 sm:$0xff] }
 0x177   :  { %v1719_v35 = vpop.f32.mrb[0].mxu1 }
 0x178   :  { %v1720_v36 = vpop.f32.mrb[1].mxu1  ;;  %1866 = vmatpush3.bf16.msra.mxu1 %v2020_v32 }
 0x179   :  { %v1721_v38 = vadd.f32 %v1720_v36, %v1719_v35  ;;  %v1722_v39 = vpop.f32.mrb[2].mxu1 }
 0x17a   :  { %v1723_v40 = vpop.f32.mrb[3].mxu1 }
 0x17b   :  { %v1075_v42 = vadd.f32 %v1721_v38, %v1034_v37  ;;  %v1724_v43 = vadd.f32 %v1723_v40, %v1722_v39 }
 0x17d   :  { %v1078_v44 = vadd.f32 %v1724_v43, %v1037_v41 }
 0x18f   :  { %v1741_v45 = vpop.f32.mrb[4].mxu0 }
 0x190   :  { %v1742_v46 = vpop.f32.mrb[5].mxu0 }
 0x191   :  { %v1743_v47 = vadd.f32 %v1742_v46, %v1741_v45  ;;  %v1744_v48 = vpop.f32.mrb[6].mxu0 }
 0x192   :  { %v1745_v49 = vpop.f32.mrb[7].mxu0 }
 0x193   :  { %v1116_v50 = vadd.f32 %v1743_v47, %v1075_v42  ;;  %v1746_v51 = vadd.f32 %v1745_v49, %v1744_v48 }
 0x195   :  { %v1119_v52 = vadd.f32 %v1746_v51, %v1078_v44 }
 0x197   :  { %v1763_v53 = vpop.f32.mrb[4].mxu1 }
 0x198   :  { %v1764_v54 = vpop.f32.mrb[5].mxu1 }
 0x199   :  { %v1765_v55 = vadd.f32 %v1764_v54, %v1763_v53  ;;  %v1766_v57 = vpop.f32.mrb[6].mxu1 }
 0x19a   :  { %v1767_v58 = vpop.f32.mrb[7].mxu1 }
 0x19b   :  { %v1157_v59 = vadd.f32 %v1765_v55, %v1116_v50  ;;  %v1768_v60 = vadd.f32 %v1767_v58, %v1766_v57 }
 0x19d   :  { %v1160_v62 = vadd.f32 %v1768_v60, %v1119_v52 }
 0x1af   :  { %v1785_v63 = vpop.f32.mrb[8].mxu0 }
 0x1b0   :  { %v1786_v0 = vpop.f32.mrb[9].mxu0 }
 0x1b1   :  { %v1787_v2 = vadd.f32 %v1786_v0, %v1785_v63  ;;  %v1788_v1 = vpop.f32.mrb[10].mxu0 }
 0x1b2   :  { %v1789_v3 = vpop.f32.mrb[11].mxu0 }
 0x1b3   :  { %v1198_v5 = vadd.f32 %v1787_v2, %v1157_v59  ;;  %v1790_v6 = vadd.f32 %v1789_v3, %v1788_v1 }
 0x1b5   :  { %v1201_v8 = vadd.f32 %v1790_v6, %v1160_v62 }
 0x1b7   :  { %v1807_v10 = vpop.f32.mrb[8].mxu1 }
 0x1b8   :  { %v1808_v11 = vpop.f32.mrb[9].mxu1 }
 0x1b9   :  { %v1809_v14 = vadd.f32 %v1808_v11, %v1807_v10  ;;  %v1810_v15 = vpop.f32.mrb[10].mxu1 }
 0x1ba   :  { %v1811_v56 = vpop.f32.mrb[11].mxu1 }
 0x1bb   :  { %v1239_v18 = vadd.f32 %v1809_v14, %v1198_v5  ;;  %v1812_v19 = vadd.f32 %v1811_v56, %v1810_v15 }
 0x1bd   :  { %v1262_v22 = vadd.f32 %v1260_v17, %v1239_v18  ;;  %v1242_v23 = vadd.f32 %v1812_v19, %v1201_v8 }
 0x1bf   :  { %v1281_v25 = vadd.f32 %v1279_v20, %v1262_v22  ;;  %v1263_v26 = vadd.f32 %v1261_v21, %v1242_v23 }
 0x1c1   :  { %v1282_v27 = vadd.f32 %v1280_v24, %v1263_v26  ;;  %v1283_v28 = vmax.f32 %v1281_v25, 0.0 }
 0x1c3   :  { %v1284_v29 = vmax.f32 %v1282_v27, 0.0 }
 0x1c5   :  { %v1285_v30 = vpack.c.bf16 %v1284_v29, %v1283_v28 }
 0x1c7   :  { %1848 = vmatmul.mubr.bf16.vlgmr.msra.gmra.mrb[12].mxu0 %v1285_v30 }
 0x29a   :  { %v1391_v34 = vpop.f32.mrb[12].mxu0 }
 0x29b   :  { %v1392_v35 = vadd.f32 %v1641_v33, %v1391_v34  ;;  %v1849_v36 = vpop.f32.mrb[13].mxu0 }
 0x29c   :  { %v1394_v37 = vpop.f32.mrb[14].mxu0 }
 0x29d   :  { %v1395_v38 = vadd.f32 %v1641_v33, %v1394_v37  ;;  %v1850_v39 = vpop.f32.mrb[15].mxu0  ;;  %v1398_v40 = vmax.f32 %v1392_v35, 0.0 }
 0x29f   :  { %v1399_v41 = vmax.f32 %v1395_v38, 0.0 }
 0x2a1   :  { %v1400_v42 = vpack.c.bf16 %v1399_v41, %v1398_v40 }
 0x2a3   :  { %1868 = vmatmul.mubr.bf16.vlgmr.msra.gmra.mrb[12].mxu1 %v1400_v42 }
 0x376   :  { %v1506_v43 = vpop.f32.mrb[12].mxu1 }
 0x377   :  { %v1507_v44 = vadd.f32 %v1650_v16, %v1506_v43  ;;  %v1869_v45 = vpop.f32.mrb[13].mxu1 }
 0x378   :  { %v1509_v46 = vpop.f32.mrb[14].mxu1 }
 0x379   :  { %1513 = vst [vmem:[%s2300_s9] sm:$0xff] %v1507_v44  ;;  %v1510_v47 = vadd.f32 %v1650_v16, %v1509_v46  ;;  %v1870_v48 = vpop.f32.mrb[15].mxu1 }
 0x37b   :  { %1514 = vst [vmem:[%s2300_s9 + $0x8] sm:$0xff] %v1510_v47 }
 0x37c   :  { %1519 = vsyncpa [#allocation4], 1 }

</bundles_post_ra>
